<compile_context>
chip_gen: v5e
topology: v5e:2x2
jax: 0.10.0
libtpu: 0.0.40
codegen_flags: <defaults>
</compile_context>

<pallas_src>
import functools

import jax
import jax.numpy as jnp
from jax.experimental import pallas as pl
from jax.experimental.pallas import tpu as pltpu


# ----------------------------- helpers ---------------------------------------
def _round_up(n, m):
    return (n + m - 1) // m * m


def _pick_tile(dim, preferred):
    for t in (preferred, 1024, 512, 256, 128, 64, 32, 16, 8):
        if t <= dim and dim % t == 0:
            return t
    return dim


# ----------------------------- Pallas kernels --------------------------------
def _feature_transform_kernel(x_ref, w_ref, out_ref):
    """out = x @ w  (bf16 operands, f32 MXU accumulation, bf16 store)."""
    out_ref[...] = jnp.dot(
        x_ref[...], w_ref[...], preferred_element_type=jnp.float32
    ).astype(out_ref.dtype)


def _aggregate_kernel(a_ref, xw_ref, b_ref, out_ref, acc_ref, *, apply_relu):
    """out = A_hat @ XW + b (optionally ReLU), K-tiled with f32 accumulator."""
    k = pl.program_id(1)

    @pl.when(k == 0)
    def _():
        acc_ref[...] = jnp.zeros_like(acc_ref)

    acc_ref[...] += jnp.dot(
        a_ref[...], xw_ref[...], preferred_element_type=jnp.float32
    )

    @pl.when(k == pl.num_programs(1) - 1)
    def _():
        h = acc_ref[...] + b_ref[...]          # f32 epilogue on the accumulator
        if apply_relu:
            h = jnp.maximum(h, 0.0)
        out_ref[...] = h.astype(out_ref.dtype)


# ----------------------------- pallas_call wrappers ---------------------------
def _feature_transform(x_bf16, w_bf16, *, block_m):
    n, cin = x_bf16.shape
    fp = w_bf16.shape[1]
    return pl.pallas_call(
        _feature_transform_kernel,
        out_shape=jax.ShapeDtypeStruct((n, fp), jnp.bfloat16),
        grid=(n // block_m,),
        in_specs=[
            pl.BlockSpec((block_m, cin), lambda i: (i, 0)),
            pl.BlockSpec((cin, fp), lambda i: (0, 0)),
        ],
        out_specs=pl.BlockSpec((block_m, fp), lambda i: (i, 0)),
        compiler_params=pltpu.CompilerParams(
            dimension_semantics=("parallel",)),
    )(x_bf16, w_bf16)


def _aggregate(a_bf16, xw_bf16, b_f32, *, block_m, block_k, apply_relu,
               out_dtype):
    n = a_bf16.shape[0]
    fp = xw_bf16.shape[1]
    kernel = functools.partial(_aggregate_kernel, apply_relu=apply_relu)
    return pl.pallas_call(
        kernel,
        out_shape=jax.ShapeDtypeStruct((n, fp), out_dtype),
        grid=(n // block_m, n // block_k),
        in_specs=[
            pl.BlockSpec((block_m, block_k), lambda i, k: (i, k)),  # A_hat tile
            pl.BlockSpec((block_k, fp), lambda i, k: (k, 0)),       # XW rows
            pl.BlockSpec((1, fp), lambda i, k: (0, 0)),             # bias
        ],
        out_specs=pl.BlockSpec((block_m, fp), lambda i, k: (i, 0)),
        scratch_shapes=[pltpu.VMEM((block_m, fp), jnp.float32)],
        compiler_params=pltpu.CompilerParams(
            dimension_semantics=("parallel", "arbitrary")),
    )(a_bf16, xw_bf16, b_f32)


def gcn_forward(a_hat, x, w1, b1, w2, b2, *, block_m=None, block_k=None):
    """Two-layer GCN forward. a_hat: (N,N) f32, x: (N,Cin) f32."""
    n = a_hat.shape[0]
    cin = x.shape[1]
    hid = w1.shape[1]
    out_c = w2.shape[1]

    hp = _round_up(hid, 128)       # lane-dense hidden dim
    op = _round_up(out_c, 128)     # lane-dense output dim

    tm = block_m if block_m is not None else _pick_tile(n, 256)
    tk = block_k if block_k is not None else _pick_tile(n, 512)

    # bf16 MXU operands; zero-padded lane dims (pads are exactly zero, so the
    # extra columns/rows never contaminate the real outputs).
    a_bf = a_hat.astype(jnp.bfloat16)
    x_bf = x.astype(jnp.bfloat16)
    w1p = jnp.zeros((cin, hp), jnp.bfloat16).at[:, :hid].set(
        w1.astype(jnp.bfloat16))
    b1p = jnp.zeros((1, hp), jnp.float32).at[:, :hid].set(
        b1.reshape(1, -1).astype(jnp.float32))
    w2p = jnp.zeros((hp, op), jnp.bfloat16).at[:hid, :out_c].set(
        w2.astype(jnp.bfloat16))
    b2p = jnp.zeros((1, op), jnp.float32).at[:, :out_c].set(
        b2.reshape(1, -1).astype(jnp.float32))

    # --- layer 1: H1 = relu(A_hat @ (X W1) + b1) --------------------------
    xw1 = _feature_transform(x_bf, w1p, block_m=tm)                 # (N, hp) bf16
    h1 = _aggregate(a_bf, xw1, b1p, block_m=tm, block_k=tk,
                    apply_relu=True, out_dtype=jnp.bfloat16)        # (N, hp) bf16

    # --- layer 2: OUT = A_hat @ (H1 W2) + b2 ------------------------------
    hw2 = _feature_transform(h1, w2p, block_m=tm)                   # (N, op) bf16
    out = _aggregate(a_bf, hw2, b2p, block_m=tm, block_k=tk,
                     apply_relu=False, out_dtype=jnp.float32)       # (N, op) f32

    return out[:, :out_c]


# ----------------------------- JAX glue ---------------------------------------
def build_normalized_adjacency(edge_index, edge_weight, num_nodes):
    """Dense GCN-normalized adjacency (matches torch_geometric gcn_norm)."""
    src = edge_index[0]
    dst = edge_index[1]
    a = jnp.zeros((num_nodes, num_nodes), jnp.float32)
    # A[i, j] holds the weight of edge j -> i (aggregation at target i).
    a = a.at[dst, src].add(edge_weight.astype(jnp.float32))
    a = a + jnp.eye(num_nodes, dtype=jnp.float32)          # self-loops (w=1)
    deg = a.sum(axis=1)
    dinv_sqrt = jnp.where(deg > 0.0, jax.lax.rsqrt(deg), 0.0)
    return dinv_sqrt[:, None] * a * dinv_sqrt[None, :]


def glorot(key, shape):
    fan_in, fan_out = shape
    limit = jnp.sqrt(6.0 / (fan_in + fan_out))
    return jax.random.uniform(key, shape, jnp.float32, -limit, limit)


# ----------------------------- reference (pure JAX, matched precision) --------
def gcn_forward_ref(a_hat, x, w1, b1, w2, b2):
    a = a_hat.astype(jnp.bfloat16)
    xw = jnp.dot(x.astype(jnp.bfloat16), w1.astype(jnp.bfloat16),
                 preferred_element_type=jnp.float32).astype(jnp.bfloat16)
    h = jnp.dot(a, xw, preferred_element_type=jnp.float32) + b1
    h = jnp.maximum(h, 0.0).astype(jnp.bfloat16)
    hw = jnp.dot(h, w2.astype(jnp.bfloat16),
                 preferred_element_type=jnp.float32).astype(jnp.bfloat16)
    return jnp.dot(a, hw, preferred_element_type=jnp.float32) + b2


if __name__ == "__main__":
    key = jax.random.PRNGKey(0)
    k_x, k_w, k_w1, k_w2 = jax.random.split(key, 4)

    # Small synthetic graph (big enough to exercise the tiled grid).
    num_nodes = 512
    in_channels = 8
    hidden_channels = 32
    out_channels = 16

    # Node features (graph.x).
    x = jax.random.normal(k_x, (num_nodes, in_channels), jnp.float32)

    # Bidirectional ring graph: edge_index (2, E), edge_attr (E,).
    idx = jnp.arange(num_nodes, dtype=jnp.int32)
    src = jnp.concatenate([idx, (idx + 1) % num_nodes])
    dst = jnp.concatenate([(idx + 1) % num_nodes, idx])
    edge_index = jnp.stack([src, dst])                       # (2, 2N)
    edge_weight = jax.random.uniform(k_w, (edge_index.shape[1],),
                                     jnp.float32, 0.1, 1.0)  # graph.edge_attr

    # Deterministic parameters (glorot weights, zero biases, like GCNConv).
    w1 = glorot(k_w1, (in_channels, hidden_channels))
    b1 = jnp.zeros((1, hidden_channels), jnp.float32)
    w2 = glorot(k_w2, (hidden_channels, out_channels))
    b2 = jnp.zeros((1, out_channels), jnp.float32)

    # Dense normalized adjacency (glue).
    a_hat = build_normalized_adjacency(edge_index, edge_weight, num_nodes)

    # Run the Pallas kernels (128-tiles => 4x4 aggregation grid at N=512).
    out = gcn_forward(a_hat, x, w1, b1, w2, b2, block_m=128, block_k=128)
    out = jax.block_until_ready(out)

    ref = gcn_forward_ref(a_hat, x, w1, b1, w2, b2)
    assert out.shape == (num_nodes, out_channels)
    assert jnp.allclose(out, ref, atol=2e-3, rtol=2e-3)

    print("KERNEL_OK")
</pallas_src>

<mosaic_0001>
module attributes {stable_mosaic.version = 11 : i64} {
  func.func @_feature_transform_kernel(%arg0: i32, %arg1: memref<128x8xbf16, #tpu.memory_space<vmem>>, %arg2: memref<8x128xbf16, #tpu.memory_space<vmem>>, %arg3: memref<128x128xbf16, #tpu.memory_space<vmem>>) attributes {dimension_semantics = [#tpu.dimension_semantics<parallel>], iteration_bounds = array<i64: 4>, scalar_prefetch = 0 : i64, scratch_operands = 0 : i64, tpu.core_type = #tpu.core_type<tc>, window_params = [{transform_indices = @transform_0, window_bounds = array<i64: 128, 8>}, {pipeline_mode = #tpu.pipeline_mode<synchronous>, transform_indices = @transform_1, window_bounds = array<i64: 8, 128>}, {transform_indices = @transform_2, window_bounds = array<i64: 128, 128>}]} {
    %c0 = arith.constant 0 : index
    %c0_0 = arith.constant 0 : index
    %0 = vector.load %arg1[%c0, %c0_0] : memref<128x8xbf16, #tpu.memory_space<vmem>>, vector<128x8xbf16>
    %c0_1 = arith.constant 0 : index
    %c0_2 = arith.constant 0 : index
    %1 = vector.load %arg2[%c0_1, %c0_2] : memref<8x128xbf16, #tpu.memory_space<vmem>>, vector<8x128xbf16>
    %cst = arith.constant dense<0.000000e+00> : vector<128x128xf32>
    %2 = tpu.matmul %0, %1, %cst {dimension_numbers = #tpu.dot_dimension_numbers<[1], [0], [0], [1], [0, 0, 1, 1], [], []>} : vector<128x8xbf16>, vector<8x128xbf16>, vector<128x128xf32> -> vector<128x128xf32>
    %3 = arith.truncf %2 : vector<128x128xf32> to vector<128x128xbf16>
    %c0_3 = arith.constant 0 : index
    %c0_4 = arith.constant 0 : index
    %4 = vector.load %arg3[%c0_3, %c0_4] : memref<128x128xbf16, #tpu.memory_space<vmem>>, vector<128x128xbf16>
    tpu.vector_store %arg3[%c0_3, %c0_4], %3 {strides = array<i32>} : memref<128x128xbf16, #tpu.memory_space<vmem>>, vector<128x128xbf16>,
    return
  }
  func.func @transform_0(%arg0: i32) -> (i32, i32) {
    %c0_i32 = arith.constant 0 : i32
    %c0_i32_0 = arith.constant 0 : i32
    return %arg0, %c0_i32 : i32, i32
  }
  func.func @transform_1(%arg0: i32) -> (i32, i32) {
    %c0_i32 = arith.constant 0 : i32
    %c0_i32_0 = arith.constant 0 : i32
    %c0_i32_1 = arith.constant 0 : i32
    return %c0_i32, %c0_i32_0 : i32, i32
  }
  func.func @transform_2(%arg0: i32) -> (i32, i32) {
    %c0_i32 = arith.constant 0 : i32
    %c0_i32_0 = arith.constant 0 : i32
    return %arg0, %c0_i32 : i32, i32
  }
}

</mosaic_0001>

<bundles_post_ra>
// kernel: tpu_custom_call.1
= control target key start
LH: loop header
LB: loop body
LE: loop exit
PB: predicated region body
PF: predicated region fallthrough
CT: control target
= control target key end

     0   :  { %7 = vsyncpa [#allocation3], 0  ;;  %s723_s0 = inlined_call_operand.vmem [shape: bf16[512,8], index: 0, kind: input, shape index: {}]   ;;  %s724_s1 = inlined_call_operand.vmem [shape: bf16[8,128], index: 1, kind: input, shape index: {}]   ;;  %s725_s2 = inlined_call_operand.hbm [shape: bf16[512,128], index: 2, kind: output, shape index: {}]  }
   0x1   :  { %9 = vsyncpa [#allocation3 + $0x1], 0  ;;  %s624_s9 = smov 0   ;;  %s626_s10 = smov 0  }
   0x2   :  { %s628_s11 = smov 0   ;;  %s630_s12 = smov 0  }
   0x3 LB: > { %s645_s13 = sadd.s32 4294967295, %s605_s12   ;;  %s391_s14 = sadd.s32 4294967294, %s605_s12   ;;  %s605_s12 = sphi %s630_s12, %s731_s12   ;;  %s601_s11 = sphi %s628_s11, %s730_s11   ;;  %s597_s10 = sphi %s626_s10, %s729_s10   ;;  %s593_s9 = sphi %s624_s9, %s728_s9  }
   0x4   : > { %s649_s15 = sadd.s32 1, %s605_s12   ;;  %s69_s16 = sadd.s32 1, %s601_s11 }
   0x5   : > { %s66_s17 = ssub.s32 %s605_s12, %s649_s15  ;;  %p79_p0 = scmp.ne.s32.totalorder %s601_s11, %s597_s10 }
   0x6   : > { %p67_p1 = scmp.eq.s32.totalorder %s66_s17, 0  ;;  %p80_p2 = scmp.eq.s32.totalorder %s645_s13, 3 }
   0x7   : > { %p85_p3 = scmp.ne.s32.totalorder %s597_s10, %s593_s9  ;;  %p86_p4 = scmp.eq.s32.totalorder %s391_s14, 3 }
   0x8   : > { %s660_s18 = scalar_select %p67_p1, %s601_s11, %s69_s16  }
   0x9   : > { %p662_p5 = por %p80_p2, %p79_p0  ;;  %p666_p6 = por %p86_p4, %p85_p3 }
   0xa   : > { %p394_p7 = scmp.ge.s32.totalorder %s605_s12, 1  ;;  %p116_p8 = scmp.lt.s32.totalorder %s605_s12, 5 }
   0xc   : > { %p117_p9 = pnand %p394_p7, %p116_p8 }
   0xd   : > { %s396_s23 = sshll.u32 (!%p117_p9), %s645_s13, 4  ;;  %s135_s28 = sand.u32 (!%p117_p9), 1, %s597_s10  }
   0xe   : > { %120 = sbr.rel (%p117_p9) target bundleno = 188 (0xbc), region = 28  ;;  %p139_p10 = scmp.lt.s32.totalorder (!%p117_p9), %s396_s23, 63 }
   0xf   : > { %s395_s29 = sshll.u32 (!%p117_p9), %s135_s28, 6  ;;  %s451_s3 = sshll.u32 (!%p117_p9), %s645_s13, 6 }
  0x10   : > { %s137_s30 = scalar_lea.vmem (!%p117_p9), [#allocation2], %s395_s29  ;;  %s325_s6 = scalar_lea.hbm (!%p117_p9), %s725_s2, %s451_s3 }
  0x11   : > { %s326_s7 = sshll.u32 (!%p117_p9), %s137_s30, 4  ;;  %s328_s8 = sshll.u32 (!%p117_p9), %s325_s6, 4  ;;  %s327_s7 = int_to_ptr.vmem [resolvable:$true] %s326_s7  ;;  %s329_s8 = int_to_ptr.hbm [resolvable:$true] %s328_s8 }
  0x12   : > { %s314_s13 = scalar_lea.sflag (!%p117_p9), [#allocation3], %s135_s28  ;;  %s557_s14 = sshra.s32 (!%p117_p9), %s329_s8, 4  ;;  %s558_s14 = int_to_ptr.hbm [resolvable:$true] %s557_s14 }
  0x13   : > { %v162_v0 = vld [vmem:[%s724_s1] sm:$0xf]  ;;  %vm228_vm0 = vcmask 1043456   ;;  %s733_s23 = smov (!%p139_p10, %s396_s23), 63  ;;  %vm203_vm1 = vcmask 64512   ;;  %s559_s16 = scalar_lea.hbm %s558_s14, 64 }
  0x14   : > { %v230_v1 = vsel %vm228_vm0, %v162_v0, 0  ;;  %s397_s24 = sshll.u32 %s733_s23, 2  ;;  %p560_p11 = scmp.ne.s32.totalorder %s558_s14, %s559_s16 }
  0x15   : > { %239 = vmatpush.bf16.msra.mxu0 %v230_v1  ;;  %499 = vmatpush.bf16.msra.mxu1 %v230_v1  ;;  %s142_s27 = scalar_lea.vmem %s723_s0, %s397_s24  ;;  %s563_s22 = scalar_lea.hbm %s725_s2, 256 }
  0x16   : > { %500 = vmatpush.bf16.msra.mxu2 %v230_v1  ;;  %501 = vmatpush.bf16.msra.mxu3 %v230_v1  ;;  %v443_v2 = vld [vmem:[%s142_s27] sm:$0xff]  ;;  %v445_v3 = vld [vmem:[%s142_s27 + $0x10] sm:$0xff]  ;;  %v444_v6 = vld [vmem:[%s142_s27 + $0x8] sm:$0xff]  ;;  %p561_p12 = pnand %p560_p11, %p662_p5  ;;  %p564_p0 = scmp.lt.s32.totalorder %s558_s14, %s725_s2 }
  0x17   : > { %v447_v4 = vld [vmem:[%s142_s27 + $0x20] sm:$0xff]  ;;  %v449_v5 = vld [vmem:[%s142_s27 + $0x30] sm:$0xff]  ;;  %v446_v7 = vld [vmem:[%s142_s27 + $0x18] sm:$0xff]  ;;  %p565_p1 = scmp.lt.s32.totalorder %s563_s22, %s559_s16 }
  0x18   : > { %430 = vmatmul.msk.bf16.vlgmr.msra.gmra.mxu0 %vm203_vm1, %v443_v2  ;;  %432 = vmatmul.msk.bf16.vlgmr.msra.gmra.mxu1 %vm203_vm1, %v445_v3  ;;  %v448_v8 = vld [vmem:[%s142_s27 + $0x28] sm:$0xff]  ;;  %v450_v9 = vld [vmem:[%s142_s27 + $0x38] sm:$0xff]  ;;  %p562_p13 = pneg %p561_p12 }
  0x19   : > { %434 = vmatmul.msk.bf16.vlgmr.msra.gmra.mxu2 %vm203_vm1, %v447_v4  ;;  %436 = vmatmul.msk.bf16.vlgmr.msra.gmra.mxu3 %vm203_vm1, %v449_v5  ;;  %p566_p2 = por %p565_p1, %p564_p0 }
  0x1b   : > { %p567_p3 = pnand %p566_p2, %p562_p13 }
  0x28   : > { %431 = vmatmul.msk.bf16.gmra.mxu0 %vm203_vm1, %v444_v6  ;;  %433 = vmatmul.msk.bf16.gmra.mxu1 %vm203_vm1, %v446_v7 }
  0x29   : > { %435 = vmatmul.msk.bf16.gmra.mxu2 %vm203_vm1, %v448_v8  ;;  %437 = vmatmul.msk.bf16.gmra.mxu3 %vm203_vm1, %v450_v9 }
  0x95   : > { %v241_v10 = vpop.f32.mrf.mxu0  ;;  %v251_v11 = vpop.f32.mrf.mxu1 }
  0x9c   : > { %v261_v12 = vpop.f32.mrf.mxu2  ;;  %v271_v13 = vpop.f32.mrf.mxu3 }
  0x9d   : > { %v243_v14 = vpop.f32.mrf.mxu0  ;;  %v253_v15 = vpop.f32.mrf.mxu1 }
  0x9e   : > { %v455_v16 = vpack.c.bf16 %v243_v14, %v241_v10  ;;  %v465_v17 = vpack.c.bf16 %v253_v15, %v251_v11 }
  0xa0   : > { %456 = vst [vmem:[%s137_s30] sm:$0xff] %v455_v16  }
  0xa1   : > { %493 = vst [vmem:[%s137_s30 + $0x10] sm:$0xff] %v465_v17  }
  0xa4   : > { %v263_v18 = vpop.f32.mrf.mxu2  ;;  %v273_v19 = vpop.f32.mrf.mxu3 }
  0xa5   : > { %v475_v20 = vpack.c.bf16 %v263_v18, %v261_v12  ;;  %v485_v21 = vpack.c.bf16 %v273_v19, %v271_v13  ;;  %v246_v22 = vpop.f32.mrf.mxu0  ;;  %v256_v23 = vpop.f32.mrf.mxu1 }
  0xa7   : > { %495 = vst [vmem:[%s137_s30 + $0x20] sm:$0xff] %v475_v20  }
  0xa8   : > { %497 = vst [vmem:[%s137_s30 + $0x30] sm:$0xff] %v485_v21  }
  0xac   : > { %v266_v24 = vpop.f32.mrf.mxu2  ;;  %v276_v25 = vpop.f32.mrf.mxu3 }
  0xad   : > { %v248_v26 = vpop.f32.mrf.mxu0  ;;  %v258_v27 = vpop.f32.mrf.mxu1 }
  0xae   : > { %v460_v28 = vpack.c.bf16 %v248_v26, %v246_v22  ;;  %v470_v29 = vpack.c.bf16 %v258_v27, %v256_v23 }
  0xb0   : > { %492 = vst [vmem:[%s137_s30 + $0x8] sm:$0xff] %v460_v28  }
  0xb1   : > { %494 = vst [vmem:[%s137_s30 + $0x18] sm:$0xff] %v470_v29  }
  0xb4   : > { %v268_v30 = vpop.f32.mrf.mxu2  ;;  %v278_v31 = vpop.f32.mrf.mxu3 }
  0xb5   : > { %v480_v32 = vpack.c.bf16 %v268_v30, %v266_v24  ;;  %v490_v33 = vpack.c.bf16 %v278_v31, %v276_v25 }
  0xb7   : > { %496 = vst [vmem:[%s137_s30 + $0x28] sm:$0xff] %v480_v32  }
  0xb8   : > { %498 = vst [vmem:[%s137_s30 + $0x38] sm:$0xff] %v490_v33  }
  0xb9   : > { %570 = shalt.err (!%p567_p3)
}
  0xba   : > { %s607_s25 = smov 64   ;;  %s608_s26 = smov 4  }
  0xbb   : > { %502 = dma.vmem_to_hbm [thread:$0]  (%p662_p5), %s327_s7, 1024, %s329_s8, %s314_s13, %s607_s25, %s607_s25, %s608_s26  }
  0xbc PF: > { %p508_p4 = scmp.ge.s32.totalorder %s605_s12, 2  ;;  %s343_s27 = sand.u32 1, %s593_s9  }
  0xbd   : > { %s344_s28 = scalar_lea.sflag [#allocation3], %s343_s27 }
  0xbe   : > { %p505_p7 = pnand %p508_p4, %p666_p6 }
  0xc0   : > { %p506_p8 = pneg %p505_p7 }
  0xc2   : > { %588 = dma.done.wait (%p506_p8), %s344_s28, 1024  }
  0xc3   : > { %590 = vsyncadd (%p506_p8), %s344_s28, 4294966272  ;;  %p12_p9 = scmp.ge.s32.totalorder %s649_s15, 6   ;;  %s728_s9 = smov %s597_s10 }
  0xc4   : > { %s729_s10 = smov %s601_s11  ;;  %s730_s11 = smov %s660_s18 }
  0xc5   : > { %s731_s12 = smov %s649_s15  ;;  %14 = sbr.rel (!%p12_p9) target bundleno = 3 (0x3), region = 63 }
  0xca   :  { %350 = vsyncpa [#allocation3], 1 }
  0xcb   :  { %352 = vsyncpa [#allocation3 + $0x1], 1 }

</bundles_post_ra>
